<compile_context>
chip_gen: v7x
topology: tpu7x:2x2x1
jax: 0.10.0
libtpu: 0.0.40
codegen_flags: <defaults>
</compile_context>

<pallas_src>
import jax
import jax.numpy as jnp
import numpy as np
from jax.experimental import pallas as pl
from jax.experimental.pallas import tpu as pltpu

_TARGET_BLOCK_BYTES = 2 * 1024 * 1024   # per input block (~10 MiB working set)


def _haar_kernel(x_ref, ms_ref, md_ref, o_ref):
    """x_ref: (1, tr, 2W), rows = [even-H row | odd-H row].
    ms_ref/md_ref: (cw, cw//2) pair-sum / pair-diff matrices (+-0.5).
    o_ref: (1, 4, tr, W2) subbands ll, lh, hl, hh."""
    two_w = x_ref.shape[2]
    w = two_w // 2
    cw = ms_ref.shape[0]
    cw2 = cw // 2
    ms = ms_ref[...]
    md = md_ref[...]
    for k in range(w // cw):            # static, small trip count
        lo = k * cw
        e = x_ref[0, :, lo:lo + cw]             # even-H rows, W-chunk k
        o = x_ref[0, :, w + lo:w + lo + cw]     # odd-H rows,  W-chunk k
        p = e + o                                # H-direction sum
        q = e - o                                # H-direction diff
        c0 = k * cw2
        o_ref[0, 0, :, c0:c0 + cw2] = jnp.dot(
            p, ms, preferred_element_type=jnp.float32).astype(o_ref.dtype)
        o_ref[0, 1, :, c0:c0 + cw2] = jnp.dot(
            q, ms, preferred_element_type=jnp.float32).astype(o_ref.dtype)
        o_ref[0, 2, :, c0:c0 + cw2] = jnp.dot(
            p, md, preferred_element_type=jnp.float32).astype(o_ref.dtype)
        o_ref[0, 3, :, c0:c0 + cw2] = jnp.dot(
            q, md, preferred_element_type=jnp.float32).astype(o_ref.dtype)


def _pick_chunk(W):
    """Even divisor of W used as the matmul contraction width (prefer <=128)."""
    divs = [d for d in range(2, W + 1, 2) if W % d == 0]
    le = [d for d in divs if d <= 128]
    if le and le[-1] >= 16:
        return le[-1]
    ge = [d for d in divs if d >= 128]
    return ge[0] if ge else W


def _snap_divisor(R, tr, m):
    """Largest multiple of m that divides R and is <= tr (0 if none)."""
    best, d = 0, m
    while d <= tr:
        if R % d == 0:
            best = d
        d += m
    return best


def haar_transform(x):
    """x: (N, C, H, W) -> (N, 4C, H//2, W//2), matching HaarTransform.forward."""
    N, C, H, W = x.shape
    assert H % 2 == 0 and W % 2 == 0, "HaarTransform needs even H and W"
    H2, W2 = H // 2, W // 2
    R = C * H2                               # rows per image in the merged view
    itemsize = jnp.dtype(x.dtype).itemsize
    sub = max(8, 32 // itemsize)             # sublane pack: 8 f32, 16 bf16

    # Free view (no copy): row r = (c, h2), columns = [even-H row | odd-H row].
    xv = x.reshape(N, R, 2 * W)

    # W-pair selection/butterfly matrices, chunked for MXU cost + VMEM size.
    cw = _pick_chunk(W)
    cw2 = cw // 2
    cols = np.arange(cw2)
    ms = np.zeros((cw, cw2), np.float32)
    md = np.zeros((cw, cw2), np.float32)
    ms[2 * cols, cols] = 0.5
    ms[2 * cols + 1, cols] = 0.5
    md[2 * cols, cols] = 0.5
    md[2 * cols + 1, cols] = -0.5
    ms = jnp.asarray(ms, dtype=x.dtype)
    md = jnp.asarray(md, dtype=x.dtype)

    # ---- row-tile selection ------------------------------------------------
    row_bytes = 2 * W * itemsize
    if R < sub:
        tr = R                                # full extent: always legal
    else:
        tr = min(R, max(sub, _TARGET_BLOCK_BYTES // row_bytes))
        tr = max(sub, (tr // sub) * sub)
        # keep >= 8 grid steps so both v7x TensorCores stay busy
        while N * pl.cdiv(R, tr) < 8 and tr > sub:
            tr = max(sub, ((tr // 2) // sub) * sub)
        snapped = _snap_divisor(R, tr, sub)   # avoid padded edge blocks if cheap
        if snapped >= max(sub, tr // 2):
            tr = snapped

    grid = (N, pl.cdiv(R, tr))

    out = pl.pallas_call(
        _haar_kernel,
        out_shape=jax.ShapeDtypeStruct((N, 4, R, W2), x.dtype),
        grid=grid,
        in_specs=[
            pl.BlockSpec((1, tr, 2 * W), lambda n, r: (n, r, 0)),
            pl.BlockSpec((cw, cw2), lambda n, r: (0, 0)),   # VMEM-resident
            pl.BlockSpec((cw, cw2), lambda n, r: (0, 0)),   # VMEM-resident
        ],
        out_specs=pl.BlockSpec((1, 4, tr, W2), lambda n, r: (n, 0, r, 0)),
        compiler_params=pltpu.CompilerParams(
            dimension_semantics=("parallel", "parallel"),
            vmem_limit_bytes=32 * 1024 * 1024,
        ),
    )(xv, ms, md)

    # (N, 4, C*H2, W2) -> (N, 4C, H2, W2): contiguous, free view (cat order).
    return out.reshape(N, 4 * C, H2, W2)


def _reference_haar(x):
    """Pure-JAX reference emulating upfirdn2d(input, k, down=2) per Haar tap."""
    s = 1.0 / jnp.sqrt(2.0)
    l = jnp.array([[s, s]], jnp.float32)
    h = jnp.array([[-s, s]], jnp.float32)
    ll, lh, hl, hh = (l.T @ l, h.T @ l, l.T @ h, h.T @ h)
    N, C, H, W = x.shape
    outs = []
    for k in (ll, lh, hl, hh):
        w = jnp.flip(k, (0, 1))                        # upfirdn2d flips kernel
        w = jnp.tile(w[None, None], (C, 1, 1, 1))       # (C, 1, 2, 2) depthwise
        o = jax.lax.conv_general_dilated(
            x, w, window_strides=(2, 2), padding="VALID",
            dimension_numbers=("NCHW", "OIHW", "NCHW"),
            feature_group_count=C)
        outs.append(o)
    return jnp.concatenate(outs, axis=1)


if __name__ == "__main__":
    key = jax.random.PRNGKey(0)
    x = jax.random.normal(key, (2, 4, 16, 16), dtype=jnp.float32)

    out = jax.block_until_ready(haar_transform(x))
    ref = jax.block_until_ready(_reference_haar(x))

    assert out.shape == (2, 16, 8, 8), out.shape
    assert out.dtype == jnp.float32
    assert jnp.allclose(out, ref, atol=1e-5, rtol=1e-5), float(
        jnp.max(jnp.abs(out - ref)))

    print("KERNEL_OK")
</pallas_src>

<mosaic_0001>
module attributes {stable_mosaic.version = 11 : i64} {
  func.func @_haar_kernel(%arg0: i32, %arg1: i32, %arg2: memref<1x8x32xf32, #tpu.memory_space<vmem>>, %arg3: memref<16x8xf32, #tpu.memory_space<vmem>>, %arg4: memref<16x8xf32, #tpu.memory_space<vmem>>, %arg5: memref<1x4x8x8xf32, #tpu.memory_space<vmem>>) attributes {dimension_semantics = [#tpu.dimension_semantics<parallel>, #tpu.dimension_semantics<parallel>], iteration_bounds = array<i64: 2, 4>, scalar_prefetch = 0 : i64, scratch_operands = 0 : i64, tpu.core_type = #tpu.core_type<tc>, window_params = [{transform_indices = @transform_0, window_bounds = array<i64: 1, 8, 32>}, {pipeline_mode = #tpu.pipeline_mode<synchronous>, transform_indices = @transform_1, window_bounds = array<i64: 16, 8>}, {pipeline_mode = #tpu.pipeline_mode<synchronous>, transform_indices = @transform_2, window_bounds = array<i64: 16, 8>}, {transform_indices = @transform_3, window_bounds = array<i64: 1, 4, 8, 8>}]} {
    %c0 = arith.constant 0 : index
    %c0_0 = arith.constant 0 : index
    %0 = vector.load %arg3[%c0, %c0_0] : memref<16x8xf32, #tpu.memory_space<vmem>>, vector<16x8xf32>
    %c0_1 = arith.constant 0 : index
    %c0_2 = arith.constant 0 : index
    %1 = vector.load %arg4[%c0_1, %c0_2] : memref<16x8xf32, #tpu.memory_space<vmem>>, vector<16x8xf32>
    %c0_3 = arith.constant 0 : index
    %c0_4 = arith.constant 0 : index
    %c0_5 = arith.constant 0 : index
    %2 = vector.load %arg2[%c0_3, %c0_4, %c0_5] : memref<1x8x32xf32, #tpu.memory_space<vmem>>, vector<1x8x16xf32>
    %3 = vector.shape_cast %2 : vector<1x8x16xf32> to vector<8x16xf32>
    %c0_6 = arith.constant 0 : index
    %c0_7 = arith.constant 0 : index
    %c16 = arith.constant 16 : index
    %4 = vector.load %arg2[%c0_6, %c0_7, %c16] : memref<1x8x32xf32, #tpu.memory_space<vmem>>, vector<1x8x16xf32>
    %5 = vector.shape_cast %4 : vector<1x8x16xf32> to vector<8x16xf32>
    %6 = arith.addf %3, %5 : vector<8x16xf32>
    %7 = arith.subf %3, %5 : vector<8x16xf32>
    %cst = arith.constant dense<0.000000e+00> : vector<8x8xf32>
    %8 = tpu.matmul %6, %0, %cst {dimension_numbers = #tpu.dot_dimension_numbers<[1], [0], [0], [1], [0, 0, 1, 1], [], []>} : vector<8x16xf32>, vector<16x8xf32>, vector<8x8xf32> -> vector<8x8xf32>
    %c0_8 = arith.constant 0 : index
    %c0_9 = arith.constant 0 : index
    %c0_10 = arith.constant 0 : index
    %c0_11 = arith.constant 0 : index
    %9 = vector.load %arg5[%c0_8, %c0_9, %c0_10, %c0_11] : memref<1x4x8x8xf32, #tpu.memory_space<vmem>>, vector<1x1x8x8xf32>
    %10 = vector.shape_cast %9 : vector<1x1x8x8xf32> to vector<8x8xf32>
    %11 = vector.shape_cast %8 : vector<8x8xf32> to vector<1x1x8x8xf32>
    tpu.vector_store %arg5[%c0_8, %c0_9, %c0_10, %c0_11], %11 {strides = array<i32>} : memref<1x4x8x8xf32, #tpu.memory_space<vmem>>, vector<1x1x8x8xf32>,
    %cst_12 = arith.constant dense<0.000000e+00> : vector<8x8xf32>
    %12 = tpu.matmul %7, %0, %cst_12 {dimension_numbers = #tpu.dot_dimension_numbers<[1], [0], [0], [1], [0, 0, 1, 1], [], []>} : vector<8x16xf32>, vector<16x8xf32>, vector<8x8xf32> -> vector<8x8xf32>
    %c0_13 = arith.constant 0 : index
    %c1 = arith.constant 1 : index
    %c0_14 = arith.constant 0 : index
    %c0_15 = arith.constant 0 : index
    %13 = vector.load %arg5[%c0_13, %c1, %c0_14, %c0_15] : memref<1x4x8x8xf32, #tpu.memory_space<vmem>>, vector<1x1x8x8xf32>
    %14 = vector.shape_cast %13 : vector<1x1x8x8xf32> to vector<8x8xf32>
    %15 = vector.shape_cast %12 : vector<8x8xf32> to vector<1x1x8x8xf32>
    tpu.vector_store %arg5[%c0_13, %c1, %c0_14, %c0_15], %15 {strides = array<i32>} : memref<1x4x8x8xf32, #tpu.memory_space<vmem>>, vector<1x1x8x8xf32>,
    %cst_16 = arith.constant dense<0.000000e+00> : vector<8x8xf32>
    %16 = tpu.matmul %6, %1, %cst_16 {dimension_numbers = #tpu.dot_dimension_numbers<[1], [0], [0], [1], [0, 0, 1, 1], [], []>} : vector<8x16xf32>, vector<16x8xf32>, vector<8x8xf32> -> vector<8x8xf32>
    %c0_17 = arith.constant 0 : index
    %c2 = arith.constant 2 : index
    %c0_18 = arith.constant 0 : index
    %c0_19 = arith.constant 0 : index
    %17 = vector.load %arg5[%c0_17, %c2, %c0_18, %c0_19] : memref<1x4x8x8xf32, #tpu.memory_space<vmem>>, vector<1x1x8x8xf32>
    %18 = vector.shape_cast %17 : vector<1x1x8x8xf32> to vector<8x8xf32>
    %19 = vector.shape_cast %16 : vector<8x8xf32> to vector<1x1x8x8xf32>
    tpu.vector_store %arg5[%c0_17, %c2, %c0_18, %c0_19], %19 {strides = array<i32>} : memref<1x4x8x8xf32, #tpu.memory_space<vmem>>, vector<1x1x8x8xf32>,
    %cst_20 = arith.constant dense<0.000000e+00> : vector<8x8xf32>
    %20 = tpu.matmul %7, %1, %cst_20 {dimension_numbers = #tpu.dot_dimension_numbers<[1], [0], [0], [1], [0, 0, 1, 1], [], []>} : vector<8x16xf32>, vector<16x8xf32>, vector<8x8xf32> -> vector<8x8xf32>
    %c0_21 = arith.constant 0 : index
    %c3 = arith.constant 3 : index
    %c0_22 = arith.constant 0 : index
    %c0_23 = arith.constant 0 : index
    %21 = vector.load %arg5[%c0_21, %c3, %c0_22, %c0_23] : memref<1x4x8x8xf32, #tpu.memory_space<vmem>>, vector<1x1x8x8xf32>
    %22 = vector.shape_cast %21 : vector<1x1x8x8xf32> to vector<8x8xf32>
    %23 = vector.shape_cast %20 : vector<8x8xf32> to vector<1x1x8x8xf32>
    tpu.vector_store %arg5[%c0_21, %c3, %c0_22, %c0_23], %23 {strides = array<i32>} : memref<1x4x8x8xf32, #tpu.memory_space<vmem>>, vector<1x1x8x8xf32>,
    return
  }
  func.func @transform_0(%arg0: i32, %arg1: i32) -> (i32, i32, i32) {
    %c0_i32 = arith.constant 0 : i32
    %c0_i32_0 = arith.constant 0 : i32
    return %arg0, %arg1, %c0_i32 : i32, i32, i32
  }
  func.func @transform_1(%arg0: i32, %arg1: i32) -> (i32, i32) {
    %c0_i32 = arith.constant 0 : i32
    %c0_i32_0 = arith.constant 0 : i32
    %c0_i32_1 = arith.constant 0 : i32
    return %c0_i32, %c0_i32_0 : i32, i32
  }
  func.func @transform_2(%arg0: i32, %arg1: i32) -> (i32, i32) {
    %c0_i32 = arith.constant 0 : i32
    %c0_i32_0 = arith.constant 0 : i32
    %c0_i32_1 = arith.constant 0 : i32
    return %c0_i32, %c0_i32_0 : i32, i32
  }
  func.func @transform_3(%arg0: i32, %arg1: i32) -> (i32, i32, i32, i32) {
    %c0_i32 = arith.constant 0 : i32
    %c0_i32_0 = arith.constant 0 : i32
    %c0_i32_1 = arith.constant 0 : i32
    return %arg0, %c0_i32, %arg1, %c0_i32_0 : i32, i32, i32, i32
  }
}

</mosaic_0001>

<bundles_post_ra>
// kernel: tpu_custom_call.1
= control target key start
LH: loop header
LB: loop body
LE: loop exit
PB: predicated region body
PF: predicated region fallthrough
CT: control target
= control target key end

     0   :  { %8 = vsyncpa [#allocation3], 0  ;;  %s1091_s0 = inlined_call_operand.hbm [shape: f32[2,32,32], index: 0, kind: input, shape index: {}]   ;;  %s1092_s1 = inlined_call_operand.vmem [shape: f32[16,8], index: 1, kind: input, shape index: {}]   ;;  %s1093_s2 = inlined_call_operand.vmem [shape: f32[16,8], index: 2, kind: input, shape index: {}]   ;;  %s1094_s3 = inlined_call_operand.vmem [shape: f32[2,4,32,8], index: 3, kind: output, shape index: {}]  }
   0x1   :  { %10 = vsyncpa [#allocation3 + $0x1], 0  ;;  %s910_s12 = smov 0   ;;  %s912_s13 = smov 0  }
   0x2   :  { %s914_s14 = smov 0   ;;  %s916_s15 = smov 0  }
   0x3   :  { %s918_s16 = smov 0   ;;  %s920_s17 = smov 0  }
   0x4   :  { %s922_s18 = smov 0   ;;  %s924_s19 = smov 0  }
   0x5 LB: > { %s638_s20 = sadd.s32 4294967295, %s883_s19   ;;  %s25_s21 = sadd.s32 1, %s875_s17  ;;  %s883_s19 = sphi %s924_s19, %s16_s19   ;;  %s879_s18 = sphi %s922_s18, %s1108_s18   ;;  %s875_s17 = sphi %s920_s17, %s1107_s17   ;;  %s871_s16 = sphi %s918_s16, %s1106_s16   ;;  %s867_s15 = sphi %s916_s15, %s1105_s15   ;;  %s863_s14 = sphi %s914_s14, %s1104_s14   ;;  %s859_s13 = sphi %s912_s13, %s1103_s13   ;;  %s855_s12 = sphi %s910_s12, %s1102_s12  }
   0x6   : > { %p26_p0 = scmp.ge.s32.totalorder %s25_s21, 4  ;;  %s28_s22 = sadd.s32 1, %s879_s18 }
   0x7   : > { %s37_s23 = sadd.s32 1, %s863_s14  ;;  %p44_p1 = scmp.ne.s32.totalorder %s863_s14, %s859_s13 }
   0x8   : > { %s1110_s21 = smov (%p26_p0, %s25_s21), 0  ;;  %s1112_s22 = smov (!%p26_p0, %s28_s22), %s879_s18 }
   0x9   : > { %s33_s24 = ssub.s32 %s875_s17, %s1110_s21  ;;  %p45_p2 = scmp.eq.s32.totalorder %s883_s19, 0 }
   0xa   : > { %p30_p3 = scmp.ge.s32.totalorder %s1112_s22, 2  ;;  %p50_p4 = scmp.ne.s32.totalorder %s859_s13, %s855_s12 }
   0xb   : > { %p964_p5 = por %p45_p2, %p44_p1  ;;  %p51_p6 = scmp.eq.s32.totalorder %s638_s20, 0 }
   0xc   : > { %s1114_s22 = smov (%p30_p3, %s1112_s22), 0  ;;  %p118_p8 = scmp.eq.s32.totalorder %s638_s20, 7 }
   0xd   : > { %p970_p7 = por %p51_p6, %p50_p4  ;;  %s32_s27 = ssub.s32 %s879_s18, %s1114_s22 }
   0xe   : > { %s34_s28 = sor.u32 %s33_s24, %s32_s27  ;;  %p979_p9 = por %p118_p8, %p44_p1 }
   0xf   : > { %p35_p10 = scmp.eq.s32.totalorder %s34_s28, 0  ;;  %p718_p11 = scmp.lt.s32.totalorder %s883_s19, 8 }
  0x10   : > { %s1097_s29 = scalar_select %p979_p9, 1, 0 }
  0x11   : > { %s150_s30 = sand.u32 1, %s863_s14   ;;  %s643_s4 = sshll.u32 %s879_s18, 2 }
  0x12   : > { %s987_s5 = scalar_select %p35_p10, %s863_s14, %s37_s23  }
  0x13   : > { %s642_s6 = sshll.u32 %s150_s30, 3  ;;  %s159_s7 = sadd.s32 %s875_s17, %s643_s4 }
  0x14   : > { %s644_s8 = sshll.u32 %s159_s7, 7  ;;  %s154_s9 = scalar_lea.vmem [#allocation2], %s642_s6 }
  0x15   : > { %s163_s10 = sshll.u32 %s154_s9, 4  ;;  %s993_s20 = scalar_lea.hbm %s1091_s0, %s644_s8  ;;  %s995_s10 = int_to_ptr.vmem [resolvable:$true] %s163_s10 }
  0x16   : > { %p999_p12 = pnand %p718_p11, %p964_p5  ;;  %s151_s24 = scalar_lea.sflag [#allocation3], %s150_s30 }
  0x17   : > { %s787_s27 = scalar_lea.hbm %s993_s20, 128  ;;  %s792_s25 = scalar_lea.hbm %s1091_s0, 1024 }
  0x18   : > { %p788_p1 = scmp.ne.s32.totalorder %s993_s20, %s787_s27  ;;  %p789_p2 = pneg %p999_p12 }
  0x19   : > { %p793_p5 = scmp.lt.u32.totalorder %s993_s20, %s1091_s0  ;;  %p794_p6 = scmp.lt.u32.totalorder %s792_s25, %s787_s27 }
  0x1a   : > { %p790_p3 = pnand %p789_p2, %p788_p1  ;;  %p796_p10 = scmp.lt.u32.totalorder %s787_s27, %s993_s20 }
  0x1b   : > { %p795_p8 = por %p794_p6, %p793_p5 }
  0x1c   : > { %p791_p4 = pneg %p790_p3 }
  0x1d   : > { %p797_p11 = por %p796_p10, %p795_p8 }
  0x1f   : > { %p798_p13 = pnand %p797_p11, %p791_p4 }
  0x21   : > { %801 = shalt.err (!%p798_p13)
}
  0x22   : > { %s802_s30 = scalar_lea.vmem %s995_s10, 128  ;;  %s885_s8 = smov [#allocation2]  }
  0x23   : > { %p803_p1 = scmp.ne.s32.totalorder %s995_s10, %s802_s30  ;;  %s807_s9 = sshll.u32 %s885_s8, 4  ;;  %s808_s9 = int_to_ptr.vmem [resolvable:$false] %s807_s9 }
  0x24   : > { %s809_s11 = scalar_lea.vmem %s808_s9, 256  ;;  %p810_p9 = scmp.lt.s32.totalorder %s995_s10, %s808_s9 }
  0x25   : > { %p805_p3 = pnand %p803_p1, %p789_p2  ;;  %p811_p5 = scmp.lt.s32.totalorder %s809_s11, %s802_s30 }
  0x27   : > { %p806_p0 = pneg %p805_p3  ;;  %p812_p6 = por %p811_p5, %p810_p9 }
  0x29   : > { %p813_p8 = pnand %p812_p6, %p806_p0 }
  0x2b   : > { %816 = shalt.err (!%p813_p8)
}
  0x2c   : > { %717 = dma.hbm_to_vmem [thread:$0]  (!%p999_p12), %s993_s20, 128, %s995_s10, %s151_s24  }
  0x2d   : > { %p1099_p13 = scmp.lt.s32.totalorder %s883_s19, 9  ;;  %p1100_p4 = scmp.ge.s32.totalorder %s883_s19, 1 }
  0x2f   : > { %p169_p2 = pnand %p1100_p4, %p1099_p13 }
  0x30   : > { %s1035_s12 = sand.u32 (!%p169_p2), 1, %s859_s13  }
  0x31   : > { %172 = sbr.rel (%p169_p2) target bundleno = 402 (0x192), region = 32  ;;  %s646_s27 = sshll.u32 (!%p169_p2), %s1035_s12, 3 }
  0x32   : > { %s175_s28 = scalar_lea.sflag (!%p169_p2), [#allocation3], %s1035_s12  ;;  %s178_s4 = scalar_lea.vmem (!%p169_p2), [#allocation2], %s646_s27 }
  0x38   : > { %850 = dma.done.wait (%p970_p7), %s175_s28, 128  }
  0x39   : > { %852 = vsyncadd (%p970_p7), %s175_s28, 4294967168  ;;  %v886_v0 = vmov 0.0|0.0   ;;  %vm887_vm0 = vmmov 0   ;;  %v888_v1 = vmov 0.0   ;;  %v204_v2 = vld [vmem:[%s178_s4] sm:$0xff]  ;;  %s889_s26 = smov 112  }
  0x3a   : > { %700 = vmatprep.subr.bf16.mxu0 %v886_v0  ;;  %703 = vmatprep.subr.bf16.mxu1 %v886_v0  ;;  %v200_v3 = vld [vmem:[%s1092_s1] sm:$0xff]  ;;  %v201_v4 = vld [vmem:[%s1092_s1 + $0x8] sm:$0xff]  ;;  %vm211_vm1 = vcmask 130048   ;;  %s647_s8 = sshll.u32 %s1035_s12, 5  ;;  %vm285_vm2 = vcmask 64512   ;;  %p1101_p7 = scmp.ne.s32.totalorder %s1097_s29, 0 }
  0x3b   : > { %676 = vmatprep.mubr.msk.f32.mxu0 %vm887_vm0, %v888_v1  ;;  %683 = vmatprep.mubr.msk.f32.mxu1 %vm887_vm0, %v888_v1  ;;  %v701_v5 = vpack.c.bf16 %v201_v4, %v200_v3  ;;  %v202_v6 = vld [vmem:[%s1093_s2] sm:$0xff]  ;;  %v203_v7 = vld [vmem:[%s1093_s2 + $0x8] sm:$0xff]  ;;  %s199_s9 = scalar_lea.vmem [#allocation4], %s647_s8  ;;  %s656_s11 = sshll.u32 (%p1101_p7), %s871_s16, 4 }
  0x3c   : > { %206 = vrot.lane.b32.xlu0 %v204_v2, %s889_s26  ;;  %v707_v9 = vpack.c.bf16 %v203_v7, %v202_v6  ;;  %s514_s12 = sadd.s32 (%p1101_p7), %s867_s15, %s656_s11 }
  0x3d   : > { %702 = vmatpush3.bf16.msra.mxu0 %v701_v5  ;;  %705 = vmatpush3.bf16.msra.mxu1 %v701_v5  ;;  %s657_s27 = sshll.u32 (%p1101_p7), %s514_s12, 3 }
  0x3e   : > { %706 = vmatprep.subr.bf16.mxu0 %v886_v0  ;;  %709 = vmatprep.subr.bf16.mxu1 %v886_v0  ;;  %s516_s10 = scalar_lea.vmem (%p1101_p7), %s1094_s3, %s657_s27 }
  0xae   : > { %v207_v8 = vpop.permute.xlu0 %206 }
  0xaf   : > { %v209_v10 = vadd.f32 %v207_v8, %v204_v2  ;;  %v210_v11 = vsub.f32 %v204_v2, %v207_v8 }
  0xb1   : > { %677 = vmatmul.mubr.msk.f32.vlgmr.msra.gmra.mrb[0].mxu0 %vm211_vm1, %v209_v10  ;;  %684 = vmatmul.mubr.msk.f32.vlgmr.msra.gmra.mrb[0].mxu1 %vm211_vm1, %v210_v11 }
  0xb2   : > { %708 = vmatpush3.bf16.msra.mxu0 %v707_v9  ;;  %711 = vmatpush3.bf16.msra.mxu1 %v707_v9 }
  0xb3   : > { %690 = vmatprep.mubr.msk.f32.mxu0 %vm887_vm0, %v888_v1  ;;  %697 = vmatprep.mubr.msk.f32.mxu1 %vm887_vm0, %v888_v1 }
  0xb5   : > { %691 = vmatmul.mubr.msk.f32.vlgmr.msra.gmra.mrb[2].mxu0 %vm211_vm1, %v209_v10  ;;  %698 = vmatmul.mubr.msk.f32.vlgmr.msra.gmra.mrb[2].mxu1 %vm211_vm1, %v210_v11 }
 0x183   : > { %512 = sbr.rel (!%p1101_p7) target bundleno = 402 (0x192), region = 40 }
 0x184   : > { %v281_v12 = vpop.f32.mrb[0].mxu0  ;;  %v356_v13 = vpop.f32.mrb[0].mxu1 }
 0x185   : > { %286 = vst.msk [vmem:[%s199_s9] sm:$0xff] %vm285_vm2, %v281_v12  ;;  %650 = vst.msk [vmem:[%s199_s9 + $0x8] sm:$0xff] %vm285_vm2, %v356_v13  ;;  %v678_v14 = vpop.f32.mrb[1].mxu0  ;;  %v685_v15 = vpop.f32.mrb[1].mxu1 }
 0x188   : > { %v428_v16 = vpop.f32.mrb[2].mxu0  ;;  %v500_v17 = vpop.f32.mrb[2].mxu1 }
 0x189   : > { %652 = vst.msk [vmem:[%s199_s9 + $0x10] sm:$0xff] %vm285_vm2, %v428_v16  ;;  %654 = vst.msk [vmem:[%s199_s9 + $0x18] sm:$0xff] %vm285_vm2, %v500_v17  ;;  %v692_v18 = vpop.f32.mrb[3].mxu0  ;;  %v699_v19 = vpop.f32.mrb[3].mxu1 }
 0x18c   : > { %v550_v20 = vld [vmem:[%s199_s9] sm:$0xff]  ;;  %v552_v21 = vld [vmem:[%s199_s9 + $0x8] sm:$0xff] }
 0x18d   : > { %551 = vst [vmem:[%s516_s10] sm:$0xff] %v550_v20  ;;  %553 = vst [vmem:[%s516_s10 + $0x20] sm:$0xff] %v552_v21 }
 0x190   : > { %v554_v22 = vld [vmem:[%s199_s9 + $0x10] sm:$0xff]  ;;  %v556_v23 = vld [vmem:[%s199_s9 + $0x18] sm:$0xff] }
 0x191   : > { %555 = vst [vmem:[%s516_s10 + $0x40] sm:$0xff] %v554_v22  ;;  %557 = vst [vmem:[%s516_s10 + $0x60] sm:$0xff] %v556_v23 }
 0x192 PF: > { %s16_s19 = sadd.s32 1, %s883_s19   ;;  %s1102_s12 = smov %s859_s13 }
 0x193   : > { %p13_p9 = scmp.ge.s32.totalorder %s16_s19, 10   ;;  %s1103_s13 = smov %s863_s14 }
 0x194   : > { %s1104_s14 = smov %s987_s5  ;;  %s1105_s15 = smov %s875_s17 }
 0x195   : > { %s1106_s16 = smov %s879_s18  ;;  %s1107_s17 = smov %s1110_s21 }
 0x196   : > { %s1108_s18 = smov %s1114_s22  ;;  %15 = sbr.rel (!%p13_p9) target bundleno = 5 (0x5), region = 113 }
 0x19d   :  { %573 = vsyncpa [#allocation3], 1 }
 0x19e   :  { %575 = vsyncpa [#allocation3 + $0x1], 1 }

</bundles_post_ra>
